<compile_context>
chip_gen: v7x
topology: tpu7x:2x2x1
jax: 0.10.0
libtpu: 0.0.40
codegen_flags: <defaults>
</compile_context>

<pallas_src>
import functools

import jax
import jax.numpy as jnp
from jax.experimental import pallas as pl
from jax.experimental.pallas import tpu as pltpu


def _round_up(x: int, m: int) -> int:
    return ((x + m - 1) // m) * m


def _lmf_kernel(xt_ref, xg_ref, xn_ref, wt_ref, wg_ref, wn_ref,
                b_ref, fw_ref, fb_ref, out_ref):
    # Three small MXU pushes: (tile_b, D_m) @ (D_m, R) -> (tile_b, R), f32 acc.
    ft = jnp.dot(xt_ref[...], wt_ref[...],
                 preferred_element_type=jnp.float32) + b_ref[0:1, :]
    fg = jnp.dot(xg_ref[...], wg_ref[...],
                 preferred_element_type=jnp.float32) + b_ref[1:2, :]
    fn = jnp.dot(xn_ref[...], wn_ref[...],
                 preferred_element_type=jnp.float32) + b_ref[2:3, :]

    # Low-rank fusion product.                                    [VPU]
    z = ft * fg * fn

    # Rank reduction on the MXU (matches PyTorch fw @ z accumulation order),
    # plus the SMEM scalar fusion bias.
    out = jnp.dot(z, fw_ref[...], preferred_element_type=jnp.float32) + fb_ref[0, 0]
    out_ref[...] = out.astype(out_ref.dtype)


def prepare_lmf_params(text_factor, graph_factor, num_factor,
                       fusion_weights, fusion_bias, param_dtype=jnp.float32):
    """One-time parameter packing (do NOT call per forward step).

    text_factor:  (R, Dt+1, 1), graph_factor: (R, Dg+1, 1), num_factor: (R, Dn+1, 1)
    fusion_weights: (1, R), fusion_bias: (1, 1)

    Returns:
      wt, wg, wn: (Dt, R), (Dg, R), (Dn, R) weight bodies (rows 1: of each factor)
      b_rows:     (3, R)  bias rows (row 0 of each factor), float32
      fw_col:     (R, 1)  fusion weights as a column, float32
      fb:         (1, 1)  fusion bias, float32 (for SMEM)
    """
    rank = text_factor.shape[0]
    wt = jnp.transpose(text_factor[:, 1:, 0], (1, 0)).astype(param_dtype)   # (Dt, R)
    wg = jnp.transpose(graph_factor[:, 1:, 0], (1, 0)).astype(param_dtype)  # (Dg, R)
    wn = jnp.transpose(num_factor[:, 1:, 0], (1, 0)).astype(param_dtype)    # (Dn, R)
    b_rows = jnp.stack([text_factor[:, 0, 0],
                        graph_factor[:, 0, 0],
                        num_factor[:, 0, 0]], axis=0).astype(jnp.float32)   # (3, R)
    fw_col = fusion_weights.reshape(rank, 1).astype(jnp.float32)            # (R, 1)
    fb = fusion_bias.reshape(1, 1).astype(jnp.float32)                      # (1, 1)
    return wt, wg, wn, b_rows, fw_col, fb


def lmf_forward(text_x, graph_x, num_x, wt, wg, wn, b_rows, fw_col, fusion_bias,
                *, activation_dtype=None, max_tile_b=8192,
                vmem_budget_bytes=20 * 1024 * 1024):
    """
    text_x: (B, Dt), graph_x: (B, Dg), num_x: (B, Dn)
    params from prepare_lmf_params()
    returns: (B, 1) float32
    """
    batch = text_x.shape[0]
    dt, rank = wt.shape
    dg = wg.shape[0]
    dn = wn.shape[0]
    d_total = dt + dg + dn

    # Optional bandwidth optimization: stream activations/weights as bf16
    # (dots still accumulate in f32). Default keeps the input dtype (f32 here).
    act_dtype = activation_dtype or text_x.dtype
    xt = text_x.astype(act_dtype)
    xg = graph_x.astype(act_dtype)
    xn = num_x.astype(act_dtype)
    wt = wt.astype(act_dtype)
    wg = wg.astype(act_dtype)
    wn = wn.astype(act_dtype)

    # Batch tile: multiple of 8 sublanes; sized so the double-buffered streamed
    # activation tiles (3 inputs, total width d_total) fit the VMEM budget.
    # Budget is conservative enough for v7x's 64 MiB physical VMEM as well.
    bytes_per = jnp.dtype(act_dtype).itemsize
    cap = max(8, (vmem_budget_bytes // (2 * d_total * bytes_per)) // 8 * 8)
    tile_b = min(max_tile_b, cap, _round_up(batch, 8))
    grid = (pl.cdiv(batch, tile_b),)

    cost = pl.CostEstimate(
        flops=2 * batch * rank * (d_total + 1) + 3 * batch * rank,
        transcendentals=0,
        bytes_accessed=batch * d_total * bytes_per + batch * 4
        + d_total * rank * bytes_per,
    )

    out = pl.pallas_call(
        _lmf_kernel,
        out_shape=jax.ShapeDtypeStruct((batch, 1), jnp.float32),
        grid=grid,
        in_specs=[
            # streamed activation tiles (double-buffered by the pipeline)
            pl.BlockSpec((tile_b, dt), lambda i: (i, 0)),
            pl.BlockSpec((tile_b, dg), lambda i: (i, 0)),
            pl.BlockSpec((tile_b, dn), lambda i: (i, 0)),
            # VMEM-resident per-modality weights (constant index_map)
            pl.BlockSpec((dt, rank), lambda i: (0, 0)),
            pl.BlockSpec((dg, rank), lambda i: (0, 0)),
            pl.BlockSpec((dn, rank), lambda i: (0, 0)),
            # VMEM-resident bias rows + fusion-weight column
            pl.BlockSpec((3, rank), lambda i: (0, 0)),
            pl.BlockSpec((rank, 1), lambda i: (0, 0)),
            # fusion bias scalar lives in SMEM (no VMEM tile / DMA stream)
            pl.BlockSpec(memory_space=pltpu.MemorySpace.SMEM),
        ],
        out_specs=pl.BlockSpec((tile_b, 1), lambda i: (i, 0)),
        compiler_params=pltpu.CompilerParams(
            dimension_semantics=("parallel",),   # megacore batch split (v7x)
            vmem_limit_bytes=32 * 1024 * 1024,   # safe on v5e/v6e/v7x
        ),
        cost_estimate=cost,
    )(xt, xg, xn, wt, wg, wn, b_rows, fw_col, fusion_bias)

    return out.astype(text_x.dtype)


def _reference(text_x, graph_x, num_x, tf, gf, nf, fw, fb):
    """Pure-JAX reference mirroring the PyTorch forward."""
    b = text_x.shape[0]
    ones = jnp.ones((b, 1), dtype=text_x.dtype)
    _t = jnp.concatenate([ones, text_x], axis=1)
    _g = jnp.concatenate([ones, graph_x], axis=1)
    _n = jnp.concatenate([ones, num_x], axis=1)
    f_t = jnp.matmul(_t[None], tf)                      # (rank, B, 1)
    f_g = jnp.matmul(_g[None], gf)
    f_n = jnp.matmul(_n[None], nf)
    fz = f_t * f_g * f_n                                # (rank, B, 1)
    out = jnp.matmul(fw, jnp.transpose(fz, (1, 0, 2)))  # (B, 1, 1)
    return out.reshape(-1, 1) + fb


if __name__ == "__main__":
    # Small, module-consistent shapes.
    batch = 2
    text_dim, graph_dim, num_dim, rank = 32, 16, 8, 4

    key = jax.random.PRNGKey(0)
    ks = jax.random.split(key, 7)

    def xavier_normal(k, shape):
        # PyTorch xavier_normal for (rank, dim+1, 1): fan_in=(dim+1)*1, fan_out=rank*1
        if len(shape) == 3:
            fan_in, fan_out = shape[1] * shape[2], shape[0] * shape[2]
        else:
            fan_in, fan_out = shape[1], shape[0]
        std = (2.0 / (fan_in + fan_out)) ** 0.5
        return std * jax.random.normal(k, shape, dtype=jnp.float32)

    text_x = jax.random.normal(ks[0], (batch, text_dim), dtype=jnp.float32)
    graph_x = jax.random.normal(ks[1], (batch, graph_dim), dtype=jnp.float32)
    num_x = jax.random.normal(ks[2], (batch, num_dim), dtype=jnp.float32)

    text_factor = xavier_normal(ks[3], (rank, text_dim + 1, 1))
    graph_factor = xavier_normal(ks[4], (rank, graph_dim + 1, 1))
    num_factor = xavier_normal(ks[5], (rank, num_dim + 1, 1))
    fusion_weights = xavier_normal(ks[6], (1, rank))
    fusion_bias = jnp.zeros((1, 1), dtype=jnp.float32)

    # One-time parameter packing (cached alongside the model params).
    wt, wg, wn, b_rows, fw_col, fb = prepare_lmf_params(
        text_factor, graph_factor, num_factor, fusion_weights, fusion_bias)

    out = lmf_forward(text_x, graph_x, num_x, wt, wg, wn, b_rows, fw_col, fb)
    out = jax.block_until_ready(out)

    ref = _reference(text_x, graph_x, num_x,
                     text_factor, graph_factor, num_factor,
                     fusion_weights, fusion_bias)
    assert out.shape == (batch, 1), out.shape
    assert jnp.allclose(out, ref, atol=1e-5, rtol=1e-5), (out, ref)

    print("KERNEL_OK")
</pallas_src>

<mosaic_0001>
module attributes {stable_mosaic.version = 11 : i64} {
  func.func @_lmf_kernel(%arg0: i32, %arg1: memref<8x32xf32, #tpu.memory_space<vmem>>, %arg2: memref<8x16xf32, #tpu.memory_space<vmem>>, %arg3: memref<8x8xf32, #tpu.memory_space<vmem>>, %arg4: memref<32x4xf32, #tpu.memory_space<vmem>>, %arg5: memref<16x4xf32, #tpu.memory_space<vmem>>, %arg6: memref<8x4xf32, #tpu.memory_space<vmem>>, %arg7: memref<3x4xf32, #tpu.memory_space<vmem>>, %arg8: memref<4x1xf32, #tpu.memory_space<vmem>>, %arg9: memref<1x1xf32, #tpu.memory_space<smem>>, %arg10: memref<8x1xf32, #tpu.memory_space<vmem>>) attributes {dimension_semantics = [#tpu.dimension_semantics<parallel>], iteration_bounds = array<i64: 1>, scalar_prefetch = 0 : i64, scratch_operands = 0 : i64, tpu.core_type = #tpu.core_type<tc>, window_params = [{transform_indices = @transform_0, window_bounds = array<i64: 8, 32>}, {transform_indices = @transform_1, window_bounds = array<i64: 8, 16>}, {transform_indices = @transform_2, window_bounds = array<i64: 8, 8>}, {pipeline_mode = #tpu.pipeline_mode<synchronous>, transform_indices = @transform_3, window_bounds = array<i64: 32, 4>}, {pipeline_mode = #tpu.pipeline_mode<synchronous>, transform_indices = @transform_4, window_bounds = array<i64: 16, 4>}, {pipeline_mode = #tpu.pipeline_mode<synchronous>, transform_indices = @transform_5, window_bounds = array<i64: 8, 4>}, {pipeline_mode = #tpu.pipeline_mode<synchronous>, transform_indices = @transform_6, window_bounds = array<i64: 3, 4>}, {pipeline_mode = #tpu.pipeline_mode<synchronous>, transform_indices = @transform_7, window_bounds = array<i64: 4, 1>}, {transform_indices = @transform_8, window_bounds = array<i64: 1, 1>}, {transform_indices = @transform_9, window_bounds = array<i64: 8, 1>}]} {
    %c0 = arith.constant 0 : index
    %c0_0 = arith.constant 0 : index
    %0 = vector.load %arg1[%c0, %c0_0] : memref<8x32xf32, #tpu.memory_space<vmem>>, vector<8x32xf32>
    %c0_1 = arith.constant 0 : index
    %c0_2 = arith.constant 0 : index
    %1 = vector.load %arg4[%c0_1, %c0_2] : memref<32x4xf32, #tpu.memory_space<vmem>>, vector<32x4xf32>
    %cst = arith.constant dense<0.000000e+00> : vector<8x4xf32>
    %2 = tpu.matmul %0, %1, %cst {dimension_numbers = #tpu.dot_dimension_numbers<[1], [0], [0], [1], [0, 0, 1, 1], [], []>} : vector<8x32xf32>, vector<32x4xf32>, vector<8x4xf32> -> vector<8x4xf32>
    %c0_3 = arith.constant 0 : index
    %c0_4 = arith.constant 0 : index
    %3 = vector.load %arg7[%c0_3, %c0_4] : memref<3x4xf32, #tpu.memory_space<vmem>>, vector<1x4xf32>
    %4 = vector.broadcast %3 : vector<1x4xf32> to vector<8x4xf32>
    %5 = arith.addf %2, %4 : vector<8x4xf32>
    %c0_5 = arith.constant 0 : index
    %c0_6 = arith.constant 0 : index
    %6 = vector.load %arg2[%c0_5, %c0_6] : memref<8x16xf32, #tpu.memory_space<vmem>>, vector<8x16xf32>
    %c0_7 = arith.constant 0 : index
    %c0_8 = arith.constant 0 : index
    %7 = vector.load %arg5[%c0_7, %c0_8] : memref<16x4xf32, #tpu.memory_space<vmem>>, vector<16x4xf32>
    %cst_9 = arith.constant dense<0.000000e+00> : vector<8x4xf32>
    %8 = tpu.matmul %6, %7, %cst_9 {dimension_numbers = #tpu.dot_dimension_numbers<[1], [0], [0], [1], [0, 0, 1, 1], [], []>} : vector<8x16xf32>, vector<16x4xf32>, vector<8x4xf32> -> vector<8x4xf32>
    %c1 = arith.constant 1 : index
    %c0_10 = arith.constant 0 : index
    %9 = vector.load %arg7[%c1, %c0_10] : memref<3x4xf32, #tpu.memory_space<vmem>>, vector<1x4xf32>
    %10 = vector.broadcast %9 : vector<1x4xf32> to vector<8x4xf32>
    %11 = arith.addf %8, %10 : vector<8x4xf32>
    %c0_11 = arith.constant 0 : index
    %c0_12 = arith.constant 0 : index
    %12 = vector.load %arg3[%c0_11, %c0_12] : memref<8x8xf32, #tpu.memory_space<vmem>>, vector<8x8xf32>
    %c0_13 = arith.constant 0 : index
    %c0_14 = arith.constant 0 : index
    %13 = vector.load %arg6[%c0_13, %c0_14] : memref<8x4xf32, #tpu.memory_space<vmem>>, vector<8x4xf32>
    %cst_15 = arith.constant dense<0.000000e+00> : vector<8x4xf32>
    %14 = tpu.matmul %12, %13, %cst_15 {dimension_numbers = #tpu.dot_dimension_numbers<[1], [0], [0], [1], [0, 0, 1, 1], [], []>} : vector<8x8xf32>, vector<8x4xf32>, vector<8x4xf32> -> vector<8x4xf32>
    %c2 = arith.constant 2 : index
    %c0_16 = arith.constant 0 : index
    %15 = vector.load %arg7[%c2, %c0_16] : memref<3x4xf32, #tpu.memory_space<vmem>>, vector<1x4xf32>
    %16 = vector.broadcast %15 : vector<1x4xf32> to vector<8x4xf32>
    %17 = arith.addf %14, %16 : vector<8x4xf32>
    %18 = arith.mulf %5, %11 : vector<8x4xf32>
    %19 = arith.mulf %18, %17 : vector<8x4xf32>
    %c0_17 = arith.constant 0 : index
    %c0_18 = arith.constant 0 : index
    %20 = vector.load %arg8[%c0_17, %c0_18] : memref<4x1xf32, #tpu.memory_space<vmem>>, vector<4x1xf32>
    %cst_19 = arith.constant dense<0.000000e+00> : vector<8x1xf32>
    %21 = tpu.matmul %19, %20, %cst_19 {dimension_numbers = #tpu.dot_dimension_numbers<[1], [0], [0], [1], [0, 0, 1, 1], [], []>} : vector<8x4xf32>, vector<4x1xf32>, vector<8x1xf32> -> vector<8x1xf32>
    %c0_20 = arith.constant 0 : index
    %c0_21 = arith.constant 0 : index
    %22 = memref.load %arg9[%c0_20, %c0_21] : memref<1x1xf32, #tpu.memory_space<smem>>
    %23 = vector.broadcast %22 : f32 to vector<8x1xf32>
    %24 = arith.addf %21, %23 : vector<8x1xf32>
    %c0_22 = arith.constant 0 : index
    %c0_23 = arith.constant 0 : index
    %25 = vector.load %arg10[%c0_22, %c0_23] : memref<8x1xf32, #tpu.memory_space<vmem>>, vector<8x1xf32>
    tpu.vector_store %arg10[%c0_22, %c0_23], %24 {strides = array<i32>} : memref<8x1xf32, #tpu.memory_space<vmem>>, vector<8x1xf32>,
    return
  }
  func.func @transform_0(%arg0: i32) -> (i32, i32) {
    %c0_i32 = arith.constant 0 : i32
    %c0_i32_0 = arith.constant 0 : i32
    return %arg0, %c0_i32 : i32, i32
  }
  func.func @transform_1(%arg0: i32) -> (i32, i32) {
    %c0_i32 = arith.constant 0 : i32
    %c0_i32_0 = arith.constant 0 : i32
    return %arg0, %c0_i32 : i32, i32
  }
  func.func @transform_2(%arg0: i32) -> (i32, i32) {
    %c0_i32 = arith.constant 0 : i32
    %c0_i32_0 = arith.constant 0 : i32
    return %arg0, %c0_i32 : i32, i32
  }
  func.func @transform_3(%arg0: i32) -> (i32, i32) {
    %c0_i32 = arith.constant 0 : i32
    %c0_i32_0 = arith.constant 0 : i32
    %c0_i32_1 = arith.constant 0 : i32
    return %c0_i32, %c0_i32_0 : i32, i32
  }
  func.func @transform_4(%arg0: i32) -> (i32, i32) {
    %c0_i32 = arith.constant 0 : i32
    %c0_i32_0 = arith.constant 0 : i32
    %c0_i32_1 = arith.constant 0 : i32
    return %c0_i32, %c0_i32_0 : i32, i32
  }
  func.func @transform_5(%arg0: i32) -> (i32, i32) {
    %c0_i32 = arith.constant 0 : i32
    %c0_i32_0 = arith.constant 0 : i32
    %c0_i32_1 = arith.constant 0 : i32
    return %c0_i32, %c0_i32_0 : i32, i32
  }
  func.func @transform_6(%arg0: i32) -> (i32, i32) {
    %c0_i32 = arith.constant 0 : i32
    %c0_i32_0 = arith.constant 0 : i32
    %c0_i32_1 = arith.constant 0 : i32
    return %c0_i32, %c0_i32_0 : i32, i32
  }
  func.func @transform_7(%arg0: i32) -> (i32, i32) {
    %c0_i32 = arith.constant 0 : i32
    %c0_i32_0 = arith.constant 0 : i32
    %c0_i32_1 = arith.constant 0 : i32
    return %c0_i32, %c0_i32_0 : i32, i32
  }
  func.func @transform_8(%arg0: i32) -> (i32, i32) {
    %c0_i32 = arith.constant 0 : i32
    %c0_i32_0 = arith.constant 0 : i32
    %c0_i32_1 = arith.constant 0 : i32
    return %c0_i32, %c0_i32_0 : i32, i32
  }
  func.func @transform_9(%arg0: i32) -> (i32, i32) {
    %c0_i32 = arith.constant 0 : i32
    %c0_i32_0 = arith.constant 0 : i32
    return %arg0, %c0_i32 : i32, i32
  }
}

</mosaic_0001>

<bundles_post_ra>
// kernel: tpu_custom_call.1
= control target key start
LH: loop header
LB: loop body
LE: loop exit
PB: predicated region body
PF: predicated region fallthrough
CT: control target
= control target key end

     0   :  { %v464_v3 = vmov 0.0|0.0   ;;  %vm465_vm0 = vmmov 0   ;;  %v466_v9 = vmov 0.0   ;;  %vm125_vm1 = vcmask 130048   ;;  %s569_s0 = inlined_call_operand.vmem [shape: f32[2,32], index: 0, kind: input, shape index: {}]   ;;  %s570_s1 = inlined_call_operand.vmem [shape: f32[2,16], index: 1, kind: input, shape index: {}]   ;;  %s571_s2 = inlined_call_operand.vmem [shape: f32[2,8], index: 2, kind: input, shape index: {}]   ;;  %s572_s3 = inlined_call_operand.vmem [shape: f32[32,4], index: 3, kind: input, shape index: {}]   ;;  %s573_s4 = inlined_call_operand.vmem [shape: f32[16,4], index: 4, kind: input, shape index: {}]   ;;  %s574_s5 = inlined_call_operand.vmem [shape: f32[8,4], index: 5, kind: input, shape index: {}]   ;;  %s575_s6 = inlined_call_operand.vmem [shape: f32[3,4], index: 6, kind: input, shape index: {}]   ;;  %s576_s7 = inlined_call_operand.vmem [shape: f32[4,1], index: 7, kind: input, shape index: {}]   ;;  %s577_s8 = inlined_call_operand.<no memory space> [shape: f32[1,1], index: 8, kind: input, shape index: {}]   ;;  %s578_s9 = inlined_call_operand.vmem [shape: f32[2,1], index: 9, kind: output, shape index: {}]  }
   0x1   :  { %v34_v0 = vld [vmem:[%s572_s3] sm:$0xff]  ;;  %v35_v1 = vld [vmem:[%s572_s3 + $0x8] sm:$0xff]  ;;  %452 = vmatprep.subr.bf16.mxu0 %v464_v3  ;;  %458 = vmatprep.subr.bf16.mxu1 %v464_v3  ;;  %v36_v6 = vld [vmem:[%s572_s3 + $0x10] sm:$0xff]  ;;  %vm43_vm2 = vcmask 261120   ;;  %vm206_vm3 = vcmask 64512   ;;  %vm289_vm4 = vcmask 1043456   ;;  %v284_v30 = vstv %s577_s8 }
   0x2   :  { %v118_v2 = vld [vmem:[%s573_s4] sm:$0xff]  ;;  %v453_v4 = vpack.c.bf16 %v35_v1, %v34_v0  ;;  %v119_v5 = vld [vmem:[%s573_s4 + $0x8] sm:$0xff]  ;;  %v37_v7 = vld [vmem:[%s572_s3 + $0x18] sm:$0xff]  ;;  %439 = vmatprep.mubr.msk.f32.mxu1 %vm465_vm0, %v466_v9  ;;  %432 = vmatprep.mubr.msk.f32.mxu0 %vm465_vm0, %v466_v9  ;;  %vm285_vm5 = vcmask 31744   ;;  %vm363_vm6 = vcmask 7168  }
   0x3   :  { %v459_v8 = vpack.c.bf16 %v119_v5, %v118_v2  ;;  %v456_v10 = vpack.c.bf16 %v37_v7, %v36_v6  ;;  %v117_v11 = vld [vmem:[%s570_s1] sm:$0xff] }
   0x4   :  { %454 = vmatpush3.bf16.msra.mxu0 %v453_v4  ;;  %v200_v12 = vld [vmem:[%s574_s5] sm:$0xff] }
   0x5   :  { %460 = vmatpush3.bf16.msra.mxu1 %v459_v8  ;;  %455 = vmatprep.subr.bf16.mxu0 %v464_v3  ;;  %v33_v13 = vld [vmem:[%s569_s0] sm:$0xff] }
   0x6   :  { %442 = vmatprep.subr.mxu1 %v466_v9  ;;  %v199_v14 = vld [vmem:[%s571_s2] sm:$0xff] }
   0x7   :  { %v282_v15 = vld [vmem:[%s576_s7] sm:$0xf] }
   0x8   :  { %457 = vmatpush3.bf16.msra.mxu0 %v456_v10  ;;  %440 = vmatmul.mubr.msk.f32.vlgmr.msra.gmra.mrb[0].mxu1 %vm125_vm1, %v117_v11  ;;  %v406_v17 = vld [vmem:[%s575_s6 + $0x1] ss:$0 sm:$0xff]  ;;  %v404_v19 = vld [vmem:[%s575_s6] ss:$0 sm:$0xff]  ;;  %v408_v20 = vld [vmem:[%s575_s6 + $0x2] ss:$0 sm:$0xff] }
   0x9   :  { %443 = vmatpush3.msra.mxu1 %v200_v12  ;;  %444 = vmatprep.mubr.msk.f32.mxu1 %vm465_vm0, %v466_v9 }
   0xa   :  { %447 = vmatprep.subr.mxu0 %v466_v9 }
   0xb   :  { %433 = vmatmul.mubr.msk.f32.vlgmr.msra.gmra.mrb[0].mxu0 %vm43_vm2, %v33_v13 }
   0xc   :  { %445 = vmatmul.mubr.msk.f32.vlgmr.msra.gmra.mrb[2].mxu1 %vm206_vm3, %v199_v14  ;;  %449 = vmatprep.mubr.msk.f32.mxu0 %vm465_vm0, %v466_v9 }
   0xd   :  { %448 = vmatpush3.msk.msra.mxu0 %vm289_vm4, %v282_v15 }
  0xdb   :  { %v195_v16 = vpop.f32.mrb[0].mxu1 }
  0xdc   :  { %v441_v18 = vpop.f32.mrb[1].mxu1  ;;  %v196_v22 = vadd.f32 %v406_v17, %v195_v16 }
  0xde   :  { %v113_v21 = vpop.f32.mrb[0].mxu0 }
  0xdf   :  { %v114_v23 = vadd.f32 %v404_v19, %v113_v21  ;;  %v434_v24 = vpop.f32.mrb[1].mxu0  ;;  %v276_v25 = vpop.f32.mrb[2].mxu1 }
  0xe0   :  { %v277_v26 = vadd.f32 %v408_v20, %v276_v25  ;;  %v446_v27 = vpop.f32.mrb[3].mxu1 }
  0xe1   :  { %v280_v28 = vmul.f32 %v196_v22, %v114_v23 }
  0xe3   :  { %v281_v29 = vmul.f32 %v280_v28, %v277_v26 }
  0xe5   :  { %450 = vmatmul.mubr.msk.f32.vlgmr.msra.gmra.mrb[2].mxu0 %vm285_vm5, %v281_v29 }
 0x1b8   :  { %v359_v31 = vpop.f32.mrb[2].mxu0 }
 0x1b9   :  { %v360_v32 = vadd.f32 %v359_v31, %v284_v30  ;;  %v451_v33 = vpop.f32.mrb[3].mxu0 }
 0x1bb   :  { %364 = vst.msk [vmem:[#allocation3] sm:$0xff] %vm363_vm6, %v360_v32 }
 0x1c2   :  { %v382_v34 = vld [vmem:[#allocation3] sm:$0x3] }
 0x1c3   :  { %383 = vst [vmem:[%s578_s9] sm:$0x3] %v382_v34 }

</bundles_post_ra>
